<compile_context>
chip_gen: v7x
topology: tpu7x:2x2x1
jax: 0.10.0
libtpu: 0.0.40
codegen_flags: <defaults>
</compile_context>

<pallas_src>
import functools

import jax
import jax.numpy as jnp
from jax.experimental import pallas as pl
from jax.experimental.pallas import tpu as pltpu


def _round_up(x, m):
    return (x + m - 1) // m * m


def _num_tensorcores():
    """TensorCores per chip (v7x: 2). Falls back to 2: the extra parallel grid
    axis is ~free on single-TC parts but is the 2x HBM lever on v7x."""
    try:
        info = pltpu.get_tpu_info()
    except Exception:
        return 2
    for attr in ("num_cores", "num_tensorcores", "tensorcores_per_chip", "core_count"):
        v = getattr(info, attr, None)
        if isinstance(v, int) and v > 0:
            return v
    return 2


def _grad_loss_kernel(sub, sh_h, sh_w, x_ref, y_ref, mh_ref, mw_ref, out_ref):
    """Grid = (P partials, blocks-per-partial).
       x_ref, y_ref  : (blk, HWp)   input dtype
       mh_ref, mw_ref: (sub, HWp)   f32 pre-scaled validity masks (1/count or 0)
       out_ref       : (1, 8, 128)  f32 per-partial partial sums (resident)."""
    i = pl.program_id(1)
    blk, hwp = x_ref.shape
    nsub = blk // sub

    @pl.when(i == 0)
    def _():
        out_ref[...] = jnp.zeros_like(out_ref)

    def body(j, acc):
        r0 = pl.multiple_of(j * sub, sub)
        d = (x_ref[pl.ds(r0, sub), :].astype(jnp.float32)
             - y_ref[pl.ds(r0, sub), :].astype(jnp.float32))        # (sub, HWp)
        # Shifted neighbours via XLU lane rotation (no relayout / masked stores).
        dh = pltpu.roll(d, shift=sh_h, axis=1) - d                   # d[f+W] - d[f]
        dw = pltpu.roll(d, shift=sh_w, axis=1) - d                   # d[f+1] - d[f]
        # Masks zero the h wrap-around, the last image column and any lane pad,
        # and carry the 1/h_count, 1/w_count MSE scaling.
        c = mh_ref[...] * (dh * dh) + mw_ref[...] * (dw * dw)        # (sub, HWp)
        # Fold into (8,128) with tile-aligned (free) slices + a log-depth add tree.
        parts = [c[r * 8:(r + 1) * 8, g * 128:(g + 1) * 128]
                 for r in range(sub // 8) for g in range(hwp // 128)]
        while len(parts) > 1:
            nxt = [parts[k] + parts[k + 1] for k in range(0, len(parts) - 1, 2)]
            if len(parts) % 2:
                nxt.append(parts[-1])
            parts = nxt
        return acc + parts[0]

    acc = jax.lax.fori_loop(0, nsub, body, jnp.zeros((8, 128), jnp.float32))
    out_ref[...] += acc[None, :, :]


def grad_loss(x, y, *, target_block_bytes=4 * 1024 * 1024):
    """x, y: (N, C, H, W). Returns scalar f32 = MSE(h_grads) + MSE(w_grads)."""
    assert x.shape == y.shape, (x.shape, y.shape)
    N, C, H, W = x.shape
    BC = N * C
    HW = H * W
    HWp = _round_up(HW, 128)                 # lane-pad the flat spatial axis

    x2 = x.reshape(BC, HW)
    y2 = y.reshape(BC, HW)
    if HWp != HW:
        # Only hit when H*W is not a multiple of 128 (one extra input copy).
        x2 = jnp.pad(x2, ((0, 0), (0, HWp - HW)))
        y2 = jnp.pad(y2, ((0, 0), (0, HWp - HW)))

    # MSE denominators use the real (unpadded) counts. Degenerate H==1 / W==1
    # contribute 0 here (PyTorch's MSELoss on an empty tensor would give nan).
    h_count = BC * (H - 1) * W
    w_count = BC * H * (W - 1)
    h_scale = 1.0 / max(h_count, 1)
    w_scale = 1.0 / max(w_count, 1)

    # Rows per inner fori_loop chunk: ~32 KiB of f32 stays in vregs (no spills).
    sub = max(8, min(128, (8192 // HWp) // 8 * 8))
    sub = min(sub, _round_up(BC, 8))

    # Rows per grid block: ~target_block_bytes of *input dtype* per input block
    # (dtype-aware: bf16 gets twice the rows), multiple of `sub`.
    # TODO(synk): very large H*W (one row-group exceeding several MiB) would
    # additionally need spatial tiling of the HW axis for v7x's 64 MiB VMEM.
    itemsize = jnp.dtype(x.dtype).itemsize
    blk = max(sub, (target_block_bytes // (HWp * itemsize)) // sub * sub)
    blk = min(blk, _round_up(BC, sub))

    n_blocks = pl.cdiv(BC, blk)
    P = 2 if (n_blocks >= 2 and _num_tensorcores() >= 2) else 1
    nblk_per_p = pl.cdiv(n_blocks, P)
    BC_pad = P * nblk_per_p * blk
    if BC_pad != BC:
        pad = BC_pad - BC                    # zero rows contribute exactly 0
        x2 = jnp.pad(x2, ((0, pad), (0, 0)))
        y2 = jnp.pad(y2, ((0, pad), (0, 0)))

    # Pre-scaled validity masks over the flat index f = h*W + w; built once,
    # DMA'd once (constant index_map), VMEM-resident for the whole grid.
    f = jnp.arange(HWp, dtype=jnp.int32)
    mh = jnp.where(f < (H - 1) * W, jnp.float32(h_scale), jnp.float32(0.0))
    mw = jnp.where((f < HW) & (f % W != W - 1), jnp.float32(w_scale), jnp.float32(0.0))
    mh = jnp.broadcast_to(mh[None, :], (sub, HWp)).astype(jnp.float32)
    mw = jnp.broadcast_to(mw[None, :], (sub, HWp)).astype(jnp.float32)

    sh_h = (HWp - W) % HWp                   # rolled[f] = d[f + W]
    sh_w = (HWp - 1) % HWp                   # rolled[f] = d[f + 1]

    kernel = functools.partial(_grad_loss_kernel, sub, sh_h, sh_w)

    blk_bytes = blk * HWp * itemsize
    vmem_limit = int(min(48 * 2**20, max(32 * 2**20, 4 * blk_bytes + 4 * 2**20)))

    out = pl.pallas_call(
        kernel,
        out_shape=jax.ShapeDtypeStruct((P, 8, 128), jnp.float32),
        grid_spec=pltpu.PrefetchScalarGridSpec(
            num_scalar_prefetch=0,
            grid=(P, nblk_per_p),
            in_specs=[
                pl.BlockSpec((blk, HWp), lambda p, i: (p * nblk_per_p + i, 0)),
                pl.BlockSpec((blk, HWp), lambda p, i: (p * nblk_per_p + i, 0)),
                pl.BlockSpec((sub, HWp), lambda p, i: (0, 0)),
                pl.BlockSpec((sub, HWp), lambda p, i: (0, 0)),
            ],
            out_specs=pl.BlockSpec((1, 8, 128), lambda p, i: (p, 0, 0)),
        ),
        compiler_params=pltpu.CompilerParams(
            dimension_semantics=("parallel", "arbitrary"),
            vmem_limit_bytes=vmem_limit,
        ),
    )(x2, y2, mh, mw)

    # Partial sums already carry the 1/count scaling: final reduce is tiny.
    return jnp.sum(out)


def _grad_loss_ref(x, y):
    xh = x[:, :, 1:, :] - x[:, :, :-1, :]
    xw = x[:, :, :, 1:] - x[:, :, :, :-1]
    yh = y[:, :, 1:, :] - y[:, :, :-1, :]
    yw = y[:, :, :, 1:] - y[:, :, :, :-1]
    return jnp.mean((xh - yh) ** 2) + jnp.mean((xw - yw) ** 2)


if __name__ == "__main__":
    key = jax.random.PRNGKey(0)
    kx, ky = jax.random.split(key)

    # Main check: small spec-consistent shape.
    N, C, H, W = 2, 4, 16, 16
    x = jax.random.normal(kx, (N, C, H, W), dtype=jnp.float32)
    y = jax.random.normal(ky, (N, C, H, W), dtype=jnp.float32)
    out = jax.block_until_ready(grad_loss(x, y))
    ref = jax.block_until_ready(_grad_loss_ref(x, y))
    assert jnp.allclose(out, ref, rtol=1e-5, atol=1e-5), (out, ref)

    # Second check: exercises multi-chunk fori_loop, multiple blocks and the
    # P=2 parallel partials with a deliberately tiny block size.
    x2 = jax.random.normal(kx, (8, 8, 16, 24), dtype=jnp.float32)
    y2 = jax.random.normal(ky, (8, 8, 16, 24), dtype=jnp.float32)
    out2 = jax.block_until_ready(grad_loss(x2, y2, target_block_bytes=64 * 1024))
    ref2 = jax.block_until_ready(_grad_loss_ref(x2, y2))
    assert jnp.allclose(out2, ref2, rtol=1e-5, atol=1e-5), (out2, ref2)

    print("KERNEL_OK")
</pallas_src>

<mosaic_0001>
module attributes {stable_mosaic.version = 11 : i64} {
  func.func @_grad_loss_kernel(%arg0: i32, %arg1: i32, %arg2: memref<8x256xf32, #tpu.memory_space<vmem>>, %arg3: memref<8x256xf32, #tpu.memory_space<vmem>>, %arg4: memref<8x256xf32, #tpu.memory_space<vmem>>, %arg5: memref<8x256xf32, #tpu.memory_space<vmem>>, %arg6: memref<1x8x128xf32, #tpu.memory_space<vmem>>) attributes {dimension_semantics = [#tpu.dimension_semantics<parallel>, #tpu.dimension_semantics<arbitrary>], iteration_bounds = array<i64: 1, 1>, scalar_prefetch = 0 : i64, scratch_operands = 0 : i64, tpu.core_type = #tpu.core_type<tc>, window_params = [{transform_indices = @transform_0, window_bounds = array<i64: 8, 256>}, {transform_indices = @transform_1, window_bounds = array<i64: 8, 256>}, {pipeline_mode = #tpu.pipeline_mode<synchronous>, transform_indices = @transform_2, window_bounds = array<i64: 8, 256>}, {pipeline_mode = #tpu.pipeline_mode<synchronous>, transform_indices = @transform_3, window_bounds = array<i64: 8, 256>}, {transform_indices = @transform_4, window_bounds = array<i64: 1, 8, 128>}]} {
    %c0_i32 = arith.constant 0 : i32
    %0 = arith.cmpi eq, %arg1, %c0_i32 : i32
    %1 = arith.extui %0 : i1 to i32
    %c0_i32_0 = arith.constant 0 : i32
    %2 = arith.cmpi ne, %1, %c0_i32_0 : i32
    scf.if %2 {
      %cst_13 = arith.constant 0.000000e+00 : f32
      %30 = vector.broadcast %cst_13 : f32 to vector<1x8x128xf32>
      %c0_14 = arith.constant 0 : index
      %c0_15 = arith.constant 0 : index
      %c0_16 = arith.constant 0 : index
      %31 = vector.load %arg6[%c0_14, %c0_15, %c0_16] : memref<1x8x128xf32, #tpu.memory_space<vmem>>, vector<1x8x128xf32>
      tpu.vector_store %arg6[%c0_14, %c0_15, %c0_16], %30 {strides = array<i32>} : memref<1x8x128xf32, #tpu.memory_space<vmem>>, vector<1x8x128xf32>,
    } else {
    }
    %cst = arith.constant 0.000000e+00 : f32
    %3 = vector.broadcast %cst : f32 to vector<8x128xf32>
    %c0_i32_1 = arith.constant 0 : i32
    %c8_i32 = arith.constant 8 : i32
    %4 = arith.muli %c0_i32_1, %c8_i32 : i32
    %5 = tpu.assume_multiple %4, 8 : i32
    %6 = arith.index_cast %5 : i32 to index
    %c0 = arith.constant 0 : index
    %7 = vector.load %arg2[%6, %c0] : memref<8x256xf32, #tpu.memory_space<vmem>>, vector<8x256xf32>
    %8 = arith.index_cast %5 : i32 to index
    %c0_2 = arith.constant 0 : index
    %9 = vector.load %arg3[%8, %c0_2] : memref<8x256xf32, #tpu.memory_space<vmem>>, vector<8x256xf32>
    %10 = arith.subf %7, %9 : vector<8x256xf32>
    %c240_i32 = arith.constant 240 : i32
    %11 = tpu.dynamic_rotate %10 by %c240_i32 dim 1 : vector<8x256xf32>, i32 -> vector<8x256xf32>
    %12 = arith.subf %11, %10 : vector<8x256xf32>
    %c255_i32 = arith.constant 255 : i32
    %13 = tpu.dynamic_rotate %10 by %c255_i32 dim 1 : vector<8x256xf32>, i32 -> vector<8x256xf32>
    %14 = arith.subf %13, %10 : vector<8x256xf32>
    %c0_3 = arith.constant 0 : index
    %c0_4 = arith.constant 0 : index
    %15 = vector.load %arg4[%c0_3, %c0_4] : memref<8x256xf32, #tpu.memory_space<vmem>>, vector<8x256xf32>
    %16 = arith.mulf %12, %12 : vector<8x256xf32>
    %17 = arith.mulf %15, %16 : vector<8x256xf32>
    %c0_5 = arith.constant 0 : index
    %c0_6 = arith.constant 0 : index
    %18 = vector.load %arg5[%c0_5, %c0_6] : memref<8x256xf32, #tpu.memory_space<vmem>>, vector<8x256xf32>
    %19 = arith.mulf %14, %14 : vector<8x256xf32>
    %20 = arith.mulf %18, %19 : vector<8x256xf32>
    %21 = arith.addf %17, %20 : vector<8x256xf32>
    %22 = vector.extract_strided_slice %21 {offsets = [0, 0], sizes = [8, 128], strides = [1, 1]} : vector<8x256xf32> to vector<8x128xf32>
    %23 = vector.extract_strided_slice %21 {offsets = [0, 128], sizes = [8, 128], strides = [1, 1]} : vector<8x256xf32> to vector<8x128xf32>
    %24 = arith.addf %22, %23 : vector<8x128xf32>
    %25 = arith.addf %3, %24 : vector<8x128xf32>
    %c1_i32 = arith.constant 1 : i32
    %c0_7 = arith.constant 0 : index
    %c0_8 = arith.constant 0 : index
    %c0_9 = arith.constant 0 : index
    %26 = vector.load %arg6[%c0_7, %c0_8, %c0_9] : memref<1x8x128xf32, #tpu.memory_space<vmem>>, vector<1x8x128xf32>
    %27 = vector.shape_cast %25 : vector<8x128xf32> to vector<1x8x128xf32>
    %28 = arith.addf %26, %27 : vector<1x8x128xf32>
    %c0_10 = arith.constant 0 : index
    %c0_11 = arith.constant 0 : index
    %c0_12 = arith.constant 0 : index
    %29 = vector.load %arg6[%c0_10, %c0_11, %c0_12] : memref<1x8x128xf32, #tpu.memory_space<vmem>>, vector<1x8x128xf32>
    tpu.vector_store %arg6[%c0_10, %c0_11, %c0_12], %28 {strides = array<i32>} : memref<1x8x128xf32, #tpu.memory_space<vmem>>, vector<1x8x128xf32>,
    return
  }
  func.func @transform_0(%arg0: i32, %arg1: i32) -> (i32, i32) {
    %c1_i32 = arith.constant 1 : i32
    %0 = arith.muli %arg0, %c1_i32 : i32
    %1 = arith.addi %0, %arg1 : i32
    %c0_i32 = arith.constant 0 : i32
    %c0_i32_0 = arith.constant 0 : i32
    return %1, %c0_i32 : i32, i32
  }
  func.func @transform_1(%arg0: i32, %arg1: i32) -> (i32, i32) {
    %c1_i32 = arith.constant 1 : i32
    %0 = arith.muli %arg0, %c1_i32 : i32
    %1 = arith.addi %0, %arg1 : i32
    %c0_i32 = arith.constant 0 : i32
    %c0_i32_0 = arith.constant 0 : i32
    return %1, %c0_i32 : i32, i32
  }
  func.func @transform_2(%arg0: i32, %arg1: i32) -> (i32, i32) {
    %c0_i32 = arith.constant 0 : i32
    %c0_i32_0 = arith.constant 0 : i32
    %c0_i32_1 = arith.constant 0 : i32
    return %c0_i32, %c0_i32_0 : i32, i32
  }
  func.func @transform_3(%arg0: i32, %arg1: i32) -> (i32, i32) {
    %c0_i32 = arith.constant 0 : i32
    %c0_i32_0 = arith.constant 0 : i32
    %c0_i32_1 = arith.constant 0 : i32
    return %c0_i32, %c0_i32_0 : i32, i32
  }
  func.func @transform_4(%arg0: i32, %arg1: i32) -> (i32, i32, i32) {
    %c0_i32 = arith.constant 0 : i32
    %c0_i32_0 = arith.constant 0 : i32
    %c0_i32_1 = arith.constant 0 : i32
    return %arg0, %c0_i32, %c0_i32_0 : i32, i32, i32
  }
}

</mosaic_0001>

<bundles_post_ra>
// kernel: tpu_custom_call.1
= control target key start
LH: loop header
LB: loop body
LE: loop exit
PB: predicated region body
PF: predicated region fallthrough
CT: control target
= control target key end

     0   :  { %9 = vsyncpa [#allocation3], 0  ;;  %s365_s0 = inlined_call_operand.hbm [shape: f32[8,256], index: 0, kind: input, shape index: {}]   ;;  %s366_s1 = inlined_call_operand.hbm [shape: f32[8,256], index: 1, kind: input, shape index: {}]   ;;  %s367_s2 = inlined_call_operand.hbm [shape: f32[8,256], index: 2, kind: input, shape index: {}]   ;;  %s368_s3 = inlined_call_operand.hbm [shape: f32[8,256], index: 3, kind: input, shape index: {}]   ;;  %s369_s4 = inlined_call_operand.hbm [shape: f32[1,8,128], index: 4, kind: output, shape index: {}]  }
   0x1   :  { %10 = vsyncpa [#allocation6], 0 }
   0x2   :  { %11 = vsyncpa [#allocation9], 0 }
   0x3   :  { %12 = vsyncpa [#allocation4], 0  ;;  %s273_s15 = smov [#allocation5]   ;;  %s274_s17 = smov [#allocation2]  }
   0x4   :  { %s37_s16 = sshll.u32 %s273_s15, 4  ;;  %s23_s18 = sshll.u32 %s274_s17, 4  ;;  %s38_s16 = int_to_ptr.vmem [resolvable:$true] %s37_s16  ;;  %s24_s18 = int_to_ptr.vmem [resolvable:$true] %s23_s18 }
   0x5   :  { %s155_s21 = scalar_lea.hbm %s366_s1, 256 }
   0x6   :  { %p156_p0 = scmp.ne.s32.totalorder %s366_s1, %s155_s21  ;;  %p159_p1 = scmp.lt.u32.totalorder %s155_s21, %s366_s1 }
   0x8   :  { %p161_p2 = pnand %p159_p1, %p156_p0 }
   0xa   :  { %164 = shalt.err (!%p161_p2)
}
   0xb   :  { %s165_s26 = scalar_lea.vmem %s38_s16, 256  ;;  %p170_p4 = scmp.lt.s32.totalorder %s38_s16, %s38_s16 }
   0xc   :  { %p166_p3 = scmp.ne.s32.totalorder %s38_s16, %s165_s26  ;;  %p171_p5 = scmp.lt.s32.totalorder %s165_s26, %s165_s26 }
   0xe   :  { %p172_p6 = por %p171_p5, %p170_p4 }
  0x10   :  { %p173_p7 = pnand %p172_p6, %p166_p3 }
  0x12   :  { %176 = shalt.err (!%p173_p7)
}
  0x13   :  { %40 = dma.hbm_to_vmem [thread:$0]  %s366_s1, 256, %s38_s16, [#allocation6]  }
  0x14   :  { %s177_s5 = scalar_lea.hbm %s365_s0, 256 }
  0x15   :  { %p178_p8 = scmp.ne.s32.totalorder %s365_s0, %s177_s5  ;;  %p181_p9 = scmp.lt.u32.totalorder %s177_s5, %s365_s0 }
  0x17   :  { %p183_p10 = pnand %p181_p9, %p178_p8 }
  0x19   :  { %186 = shalt.err (!%p183_p10)
}
  0x1a   :  { %s187_s10 = scalar_lea.vmem %s24_s18, 256  ;;  %p192_p12 = scmp.lt.s32.totalorder %s24_s18, %s24_s18 }
  0x1b   :  { %p188_p11 = scmp.ne.s32.totalorder %s24_s18, %s187_s10  ;;  %p193_p13 = scmp.lt.s32.totalorder %s187_s10, %s187_s10 }
  0x1d   :  { %p194_p0 = por %p193_p13, %p192_p12 }
  0x1f   :  { %p195_p1 = pnand %p194_p0, %p188_p11 }
  0x21   :  { %198 = shalt.err (!%p195_p1)
}
  0x22   :  { %26 = dma.hbm_to_vmem [thread:$0]  %s365_s0, 256, %s24_s18, [#allocation3]  }
  0x23   :  { %s275_s12 = smov [#allocation7]   ;;  %s276_s14 = smov [#allocation8]  }
  0x24   :  { %s47_s13 = sshll.u32 %s275_s12, 4  ;;  %s57_s15 = sshll.u32 %s276_s14, 4  ;;  %s48_s13 = int_to_ptr.vmem [resolvable:$true] %s47_s13  ;;  %s58_s15 = int_to_ptr.vmem [resolvable:$true] %s57_s15 }
  0x25   :  { %s199_s19 = scalar_lea.hbm %s367_s2, 256 }
  0x26   :  { %p200_p2 = scmp.ne.s32.totalorder %s367_s2, %s199_s19  ;;  %p203_p3 = scmp.lt.u32.totalorder %s199_s19, %s367_s2 }
  0x28   :  { %p205_p4 = pnand %p203_p3, %p200_p2 }
  0x2a   :  { %208 = shalt.err (!%p205_p4)
}
  0x2b   :  { %s209_s0 = scalar_lea.vmem %s48_s13, 256  ;;  %p214_p6 = scmp.lt.s32.totalorder %s48_s13, %s48_s13 }
  0x2c   :  { %p210_p5 = scmp.ne.s32.totalorder %s48_s13, %s209_s0  ;;  %p215_p7 = scmp.lt.s32.totalorder %s209_s0, %s209_s0 }
  0x2e   :  { %p216_p8 = por %p215_p7, %p214_p6 }
  0x30   :  { %p217_p9 = pnand %p216_p8, %p210_p5 }
  0x32   :  { %220 = shalt.err (!%p217_p9)
}
  0x33   :  { %50 = dma.hbm_to_vmem [thread:$0]  %s367_s2, 256, %s48_s13, [#allocation6]  }
  0x34   :  { %s221_s27 = scalar_lea.hbm %s368_s3, 256 }
  0x35   :  { %p222_p10 = scmp.ne.s32.totalorder %s368_s3, %s221_s27  ;;  %p225_p11 = scmp.lt.u32.totalorder %s221_s27, %s368_s3 }
  0x37   :  { %p227_p12 = pnand %p225_p11, %p222_p10 }
  0x39   :  { %230 = shalt.err (!%p227_p12)
}
  0x3a   :  { %s231_s6 = scalar_lea.vmem %s58_s15, 256  ;;  %p236_p0 = scmp.lt.s32.totalorder %s58_s15, %s58_s15 }
  0x3b   :  { %p232_p13 = scmp.ne.s32.totalorder %s58_s15, %s231_s6  ;;  %p237_p1 = scmp.lt.s32.totalorder %s231_s6, %s231_s6 }
  0x3d   :  { %p238_p2 = por %p237_p1, %p236_p0 }
  0x3f   :  { %p239_p3 = pnand %p238_p2, %p232_p13 }
  0x41   :  { %242 = shalt.err (!%p239_p3)
}
  0x42   :  { %60 = dma.hbm_to_vmem [thread:$0]  %s368_s3, 256, %s58_s15, [#allocation9]  }
  0x43   :  { %265 = dma.done.wait [#allocation3], 256  }
  0x44   :  { %266 = vsyncadd [#allocation3], 4294967040 }
  0x45   :  { %267 = dma.done.wait [#allocation6], 512  }
  0x46   :  { %268 = vsyncadd [#allocation6], 4294966784 }
  0x47   :  { %269 = dma.done.wait [#allocation9], 256  }
  0x48   :  { %270 = vsyncadd [#allocation9], 4294967040  ;;  %v83_v0 = vld [vmem:[#allocation2] sm:$0xff]  ;;  %v87_v1 = vld [vmem:[#allocation5] sm:$0xff]  ;;  %s277_s8 = smov 127   ;;  %s278_s9 = smov 112   ;;  %v95_v6 = vlaneseq }
  0x49   :  { %v84_v2 = vld [vmem:[#allocation2 + $0x8] sm:$0xff]  ;;  %v89_v3 = vsub.f32 %v83_v0, %v87_v1  ;;  %v88_v4 = vld [vmem:[#allocation5 + $0x8] sm:$0xff]  ;;  %v117_v16 = vld [vmem:[#allocation8] sm:$0xff]  ;;  %s279_s3 = smov [#allocation10]  }
  0x4a   :  { %v90_v5 = vsub.f32 %v84_v2, %v88_v4  ;;  %v96_v7 = vand.u32 127, %v95_v6  ;;  %v118_v21 = vld [vmem:[#allocation8 + $0x8] sm:$0xff]  ;;  %v111_v22 = vld [vmem:[#allocation7] sm:$0xff]  ;;  %v112_v23 = vld [vmem:[#allocation7 + $0x8] sm:$0xff]  ;;  %s136_s10 = sshll.u32 %s279_s3, 4  ;;  %s137_s10 = int_to_ptr.vmem [resolvable:$true] %s136_s10 }
  0x4b   :  { %102 = vrot.lane.b32.xlu1 %v89_v3, %s277_s8  ;;  %91 = vrot.lane.b32.xlu0 %v89_v3, %s278_s9  ;;  %s243_s1 = scalar_lea.vmem %s137_s10, 128  ;;  %p248_p5 = scmp.lt.s32.totalorder %s137_s10, %s137_s10 }
  0x4c   :  { %vm106_vm0 = vcmp.lt.s32.totalorder %v96_v7, 127  ;;  %vm97_vm1 = vcmp.lt.s32.totalorder %v96_v7, 112  ;;  %p244_p4 = scmp.ne.s32.totalorder %s137_s10, %s243_s1  ;;  %p249_p6 = scmp.lt.s32.totalorder %s243_s1, %s243_s1 }
  0x4e   :  { %p250_p7 = por %p249_p6, %p248_p5 }
  0x4f   :  { %104 = vrot.lane.b32.xlu1 %v90_v5, %s277_s8  ;;  %93 = vrot.lane.b32.xlu0 %v90_v5, %s278_s9 }
  0x50   :  { %p251_p8 = pnand %p250_p7, %p244_p4 }
  0xbd   :  { %v103_v8 = vpop.permute.xlu1 %102  ;;  %v92_v9 = vpop.permute.xlu0 %91 }
  0xc1   :  { %v105_v10 = vpop.permute.xlu1 %104  ;;  %v94_v11 = vpop.permute.xlu0 %93 }
  0xc2   :  { %v107_v12 = vsel %vm106_vm0, %v103_v8, %v105_v10  ;;  %v108_v13 = vsel %vm106_vm0, %v105_v10, %v103_v8  ;;  %v98_v14 = vsel %vm97_vm1, %v92_v9, %v94_v11  ;;  %v99_v15 = vsel %vm97_vm1, %v94_v11, %v92_v9 }
  0xc3   :  { %v109_v17 = vsub.f32 %v107_v12, %v89_v3  ;;  %v110_v18 = vsub.f32 %v108_v13, %v90_v5  ;;  %v100_v19 = vsub.f32 %v98_v14, %v89_v3  ;;  %v101_v20 = vsub.f32 %v99_v15, %v90_v5 }
  0xc5   :  { %v119_v24 = vmul.f32 %v109_v17, %v109_v17  ;;  %v120_v25 = vmul.f32 %v110_v18, %v110_v18  ;;  %v113_v26 = vmul.f32 %v100_v19, %v100_v19  ;;  %v114_v27 = vmul.f32 %v101_v20, %v101_v20 }
  0xc7   :  { %v121_v28 = vmul.f32 %v119_v24, %v117_v16  ;;  %v122_v29 = vmul.f32 %v120_v25, %v118_v21  ;;  %v115_v30 = vmul.f32 %v113_v26, %v111_v22  ;;  %v116_v31 = vmul.f32 %v114_v27, %v112_v23 }
  0xc9   :  { %v123_v32 = vadd.f32 %v121_v28, %v115_v30  ;;  %v124_v33 = vadd.f32 %v122_v29, %v116_v31 }
  0xcb   :  { %v125_v34 = vadd.f32 %v124_v33, %v123_v32 }
  0xcd   :  { %129 = vst [vmem:[#allocation10] sm:$0xff] %v125_v34 }
  0xce   :  { %254 = shalt.err (!%p251_p8)
}
  0xcf   :  { %s255_s13 = scalar_lea.hbm %s369_s4, 128 }
  0xd0   :  { %p256_p9 = scmp.ne.s32.totalorder %s369_s4, %s255_s13  ;;  %p259_p10 = scmp.lt.u32.totalorder %s255_s13, %s369_s4 }
  0xd2   :  { %p261_p11 = pnand %p259_p10, %p256_p9 }
  0xd4   :  { %264 = shalt.err (!%p261_p11)
}
  0xd5   :  { %139 = dma.vmem_to_hbm [thread:$0]  %s137_s10, 128, %s369_s4, [#allocation4]  }
  0xd6   :  { %271 = dma.done.wait [#allocation4], 128  }
  0xd7   :  { %272 = vsyncadd [#allocation4], 4294967168 }
  0xd8   :  { %143 = vsyncpa [#allocation3], 1 }
  0xd9   :  { %144 = vsyncpa [#allocation6], 1 }
  0xda   :  { %145 = vsyncpa [#allocation9], 1 }
  0xdb   :  { %146 = vsyncpa [#allocation4], 1 }

</bundles_post_ra>
